<compile_context>
chip_gen: v7x
topology: tpu7x:2x2x1
jax: 0.10.0
libtpu: 0.0.40
codegen_flags: <defaults>
</compile_context>

<pallas_src>
import math
import functools

import jax
import jax.numpy as jnp
from jax.experimental import pallas as pl
from jax.experimental.pallas import tpu as pltpu


# ---------------------------------------------------------------------------
# Stage 1: cumulative-sum embeddings (tiny; exact bf16 0/1 matmuls on the MXU)
# ---------------------------------------------------------------------------
def _embed_kernel(nm_ref, tril_ref, triu_ref, emb_ref, *, normalize, scale):
    # nm_ref:   (1, H, W) bf16 not_mask (exactly 0/1)
    # tril_ref: (H, H)    bf16 lower-triangular ones (cumsum over rows / H axis)
    # triu_ref: (W, W)    bf16 upper-triangular ones (cumsum over cols / W axis)
    nm = nm_ref[0]                                                       # (H, W) bf16
    y = jnp.dot(tril_ref[...], nm, preferred_element_type=jnp.float32)   # (H, W) y_embed
    x = jnp.dot(nm, triu_ref[...], preferred_element_type=jnp.float32)   # (H, W) x_embed

    if normalize:
        eps = 1e-6
        H = y.shape[0]
        W = x.shape[1]
        col_tot = y[H - 1:H, :]          # (1, W) == y_embed[-1, :]   (free from the cumsum)
        row_tot = x[:, W - 1:W]          # (H, 1) == x_embed[:, -1]
        y = (y - 0.5) * (scale * pl.reciprocal(col_tot + eps))
        x = (x - 0.5) * (scale * pl.reciprocal(row_tot + eps))

    emb_ref[0, 0] = y
    emb_ref[0, 1] = x


# ---------------------------------------------------------------------------
# Stage 2: broadcast + single-sin + lane-dense store over flattened spatial
# ---------------------------------------------------------------------------
def _sin_kernel(emb_ref, inv_dim_t_ref, phase_ref, out_ref, *, num_pos_feats):
    P = num_pos_feats
    inv = inv_dim_t_ref[...]             # (P, 1)  1 / dim_t
    ph = phase_ref[...]                  # (P, 1)  0 or pi/2  (cos(x) = sin(x + pi/2))
    y_flat = emb_ref[0, 0:1, :]          # (1, S_tile)
    x_flat = emb_ref[0, 1:2, :]          # (1, S_tile)
    # NOTE: on v6e/v7x the mul/add feeding sin could run in bf16 when normalize=True
    # (args bounded by ~2*pi); kept f32 for exactness across all inputs.
    out_ref[0, :P, :] = jnp.sin(y_flat * inv + ph)     # pos_y channels
    out_ref[0, P:, :] = jnp.sin(x_flat * inv + ph)     # pos_x channels


# ---------------------------------------------------------------------------
# Generation-aware tiling helpers
# ---------------------------------------------------------------------------
def _vmem_budget_bytes():
    """(per-step tile budget, VMEM capacity). v7x has 64 MiB VMEM; v5e/v6e have 128 MiB."""
    try:
        cap = pltpu.get_tpu_info().vmem_capacity_bytes
    except Exception:
        cap = 64 * 1024 * 1024                      # assume the smallest (v7x) if unknown
    budget = (24 if cap <= 64 * 1024 * 1024 else 48) * 1024 * 1024
    return budget, cap


def _choose_s_tile(S, P, B, budget):
    """Largest 128-lane-aligned spatial tile fitting the budget; >=2 grid points when B==1."""
    # bytes per spatial element per grid step:
    #   emb in   (1, 2, s)  f32 double-buffered : 2*2*4
    #   pos out  (1, 2P, s) f32 double-buffered : 2*2P*4
    #   live sin temporaries (~2 x (P, s) f32)  : 2*P*4
    per_elem = 2 * 2 * 4 + 2 * (2 * P) * 4 + 2 * P * 4
    max_tile = max(128, (budget // per_elem) // 128 * 128)

    if S <= max_tile:
        s_tile = S
    else:
        s_tile = 0
        for cand in range(max_tile, 0, -128):        # largest 128-multiple divisor of S
            if S % cand == 0:
                s_tile = cand
                break
        if s_tile == 0:                              # no aligned divisor: keep 128-multiple
            s_tile = max_tile                        # tile; ragged last block is masked

    # Megacore (v7x has 2 TensorCores): guarantee >= 2 grid points for single-batch calls.
    if B == 1 and s_tile >= S and S >= 256:
        s_tile = ((S + 1) // 2 + 127) // 128 * 128
    return s_tile


# ---------------------------------------------------------------------------
# Wrapper
# ---------------------------------------------------------------------------
def position_encoding_sine(mask, num_pos_feats=64, temperature=10000,
                           normalize=False, scale=None):
    """mask: (B, H, W) bool.  Returns (B, 2*num_pos_feats, H, W) float32 (NCHW)."""
    if scale is not None and normalize is False:
        raise ValueError("normalize should be true if scale is passed")
    if scale is None:
        scale = 2 * math.pi

    B, H, W = mask.shape
    P = num_pos_feats
    S = H * W

    # --- tiny parameter / glue setup (exact: 0/1 values in bf16) ---
    nm = (~mask).astype(jnp.bfloat16)                         # (B, H, W)
    tril = jnp.tril(jnp.ones((H, H), jnp.bfloat16))           # cumsum over H (rows)
    triu = jnp.triu(jnp.ones((W, W), jnp.bfloat16))           # cumsum over W (cols)
    i = jnp.arange(P, dtype=jnp.float32)
    dim_t = jnp.float32(temperature) ** (2.0 * jnp.floor(i / 2.0) / P)
    inv_dim_t = (1.0 / dim_t).reshape(P, 1)
    phase = ((i % 2.0) * (math.pi / 2)).reshape(P, 1)

    budget, vmem_cap = _vmem_budget_bytes()
    vmem_limit = int(min(budget + 16 * 1024 * 1024, vmem_cap))

    # ---- stage 1: y/x cumulative embeddings -> (B, 2, H, W) f32 ----
    embed = pl.pallas_call(
        functools.partial(_embed_kernel, normalize=normalize, scale=scale),
        out_shape=jax.ShapeDtypeStruct((B, 2, H, W), jnp.float32),
        grid=(B,),
        in_specs=[
            pl.BlockSpec((1, H, W), lambda b: (b, 0, 0)),
            pl.BlockSpec((H, H), lambda b: (0, 0)),            # resident (constant index map)
            pl.BlockSpec((W, W), lambda b: (0, 0)),            # resident (constant index map)
        ],
        out_specs=pl.BlockSpec((1, 2, H, W), lambda b: (b, 0, 0, 0)),
        compiler_params=pltpu.CompilerParams(
            dimension_semantics=("parallel",),
            vmem_limit_bytes=vmem_limit),
    )(nm, tril, triu)

    # Free metadata reshape (row-major == NCHW order): replaces the in-kernel flatten.
    embed_flat = embed.reshape(B, 2, S)

    # ---- stage 2: single-sin outer product with lane-dense flattened output ----
    s_tile = _choose_s_tile(S, P, B, budget)
    n_s = pl.cdiv(S, s_tile)

    cost = pl.CostEstimate(
        flops=4 * B * 2 * P * S,
        transcendentals=B * 2 * P * S,
        bytes_accessed=4 * (B * 2 * S + B * 2 * P * S + 4 * P),
    )

    out = pl.pallas_call(
        functools.partial(_sin_kernel, num_pos_feats=P),
        out_shape=jax.ShapeDtypeStruct((B, 2 * P, S), jnp.float32),
        grid=(B, n_s),
        in_specs=[
            pl.BlockSpec((1, 2, s_tile), lambda b, s: (b, 0, s)),
            pl.BlockSpec((P, 1), lambda b, s: (0, 0)),
            pl.BlockSpec((P, 1), lambda b, s: (0, 0)),
        ],
        out_specs=pl.BlockSpec((1, 2 * P, s_tile), lambda b, s: (b, 0, s)),
        compiler_params=pltpu.CompilerParams(
            dimension_semantics=("parallel", "parallel"),
            vmem_limit_bytes=vmem_limit),
        cost_estimate=cost,
    )(embed_flat, inv_dim_t, phase)

    # (B, 2P, H*W) -> (B, 2P, H, W): free metadata reshape, already in NCHW order.
    return out.reshape(B, 2 * P, H, W)


# ---------------------------------------------------------------------------
# Pure-JAX reference mirroring the PyTorch forward (for verification)
# ---------------------------------------------------------------------------
def _reference(mask, num_pos_feats, temperature, normalize, scale):
    if scale is None:
        scale = 2 * math.pi
    not_mask = (~mask).astype(jnp.float32)
    y_embed = jnp.cumsum(not_mask, axis=1)
    x_embed = jnp.cumsum(not_mask, axis=2)
    if normalize:
        eps = 1e-6
        y_embed = (y_embed - 0.5) / (y_embed[:, -1:, :] + eps) * scale
        x_embed = (x_embed - 0.5) / (x_embed[:, :, -1:] + eps) * scale
    i = jnp.arange(num_pos_feats, dtype=jnp.float32)
    dim_t = jnp.float32(temperature) ** (2.0 * jnp.floor(i / 2.0) / num_pos_feats)
    pos_x = x_embed[:, :, :, None] / dim_t
    pos_y = y_embed[:, :, :, None] / dim_t
    pos_x = jnp.stack((jnp.sin(pos_x[:, :, :, 0::2]), jnp.cos(pos_x[:, :, :, 1::2])),
                      axis=4).reshape(*pos_x.shape[:3], -1)
    pos_y = jnp.stack((jnp.sin(pos_y[:, :, :, 0::2]), jnp.cos(pos_y[:, :, :, 1::2])),
                      axis=4).reshape(*pos_y.shape[:3], -1)
    pos = jnp.concatenate((pos_y, pos_x), axis=3)
    return jnp.transpose(pos, (0, 3, 1, 2))


if __name__ == "__main__":
    key = jax.random.PRNGKey(0)
    B, C, H, W = 2, 4, 16, 16
    num_pos_feats = 32
    temperature = 10000

    kx, km = jax.random.split(key)
    x = jax.random.normal(kx, (B, C, H, W), jnp.float32)        # unused by the op (as in PyTorch)
    mask = jax.random.bernoulli(km, p=0.3, shape=(B, H, W))     # (B, H, W) bool

    for normalize in (False, True):
        pos = position_encoding_sine(mask, num_pos_feats=num_pos_feats,
                                     temperature=temperature, normalize=normalize)
        pos = jax.block_until_ready(pos)
        ref = _reference(mask, num_pos_feats, temperature, normalize, None)
        assert pos.shape == (B, 2 * num_pos_feats, H, W)
        assert jnp.allclose(pos, ref, atol=1e-4, rtol=1e-4), f"mismatch (normalize={normalize})"

    print("KERNEL_OK")
</pallas_src>

<mosaic_0001>
module attributes {stable_mosaic.version = 11 : i64} {
  func.func @_embed_kernel(%arg0: i32, %arg1: memref<1x16x16xbf16, #tpu.memory_space<vmem>>, %arg2: memref<16x16xbf16, #tpu.memory_space<vmem>>, %arg3: memref<16x16xbf16, #tpu.memory_space<vmem>>, %arg4: memref<1x2x16x16xf32, #tpu.memory_space<vmem>>) attributes {dimension_semantics = [#tpu.dimension_semantics<parallel>], iteration_bounds = array<i64: 2>, scalar_prefetch = 0 : i64, scratch_operands = 0 : i64, tpu.core_type = #tpu.core_type<tc>, window_params = [{transform_indices = @transform_0, window_bounds = array<i64: 1, 16, 16>}, {pipeline_mode = #tpu.pipeline_mode<synchronous>, transform_indices = @transform_1, window_bounds = array<i64: 16, 16>}, {pipeline_mode = #tpu.pipeline_mode<synchronous>, transform_indices = @transform_2, window_bounds = array<i64: 16, 16>}, {transform_indices = @transform_3, window_bounds = array<i64: 1, 2, 16, 16>}]} {
    %c0 = arith.constant 0 : index
    %c0_0 = arith.constant 0 : index
    %c0_1 = arith.constant 0 : index
    %0 = vector.load %arg1[%c0, %c0_0, %c0_1] : memref<1x16x16xbf16, #tpu.memory_space<vmem>>, vector<1x16x16xbf16>
    %1 = vector.shape_cast %0 : vector<1x16x16xbf16> to vector<16x16xbf16>
    %c0_2 = arith.constant 0 : index
    %c0_3 = arith.constant 0 : index
    %2 = vector.load %arg2[%c0_2, %c0_3] : memref<16x16xbf16, #tpu.memory_space<vmem>>, vector<16x16xbf16>
    %cst = arith.constant dense<0.000000e+00> : vector<16x16xf32>
    %3 = tpu.matmul %2, %1, %cst {dimension_numbers = #tpu.dot_dimension_numbers<[1], [0], [0], [1], [0, 0, 1, 1], [], []>} : vector<16x16xbf16>, vector<16x16xbf16>, vector<16x16xf32> -> vector<16x16xf32>
    %c0_4 = arith.constant 0 : index
    %c0_5 = arith.constant 0 : index
    %4 = vector.load %arg3[%c0_4, %c0_5] : memref<16x16xbf16, #tpu.memory_space<vmem>>, vector<16x16xbf16>
    %cst_6 = arith.constant dense<0.000000e+00> : vector<16x16xf32>
    %5 = tpu.matmul %1, %4, %cst_6 {dimension_numbers = #tpu.dot_dimension_numbers<[1], [0], [0], [1], [0, 0, 1, 1], [], []>} : vector<16x16xbf16>, vector<16x16xbf16>, vector<16x16xf32> -> vector<16x16xf32>
    %c0_7 = arith.constant 0 : index
    %c0_8 = arith.constant 0 : index
    %c0_9 = arith.constant 0 : index
    %c0_10 = arith.constant 0 : index
    %6 = vector.load %arg4[%c0_7, %c0_8, %c0_9, %c0_10] : memref<1x2x16x16xf32, #tpu.memory_space<vmem>>, vector<1x1x16x16xf32>
    %7 = vector.shape_cast %6 : vector<1x1x16x16xf32> to vector<16x16xf32>
    %8 = vector.shape_cast %3 : vector<16x16xf32> to vector<1x1x16x16xf32>
    tpu.vector_store %arg4[%c0_7, %c0_8, %c0_9, %c0_10], %8 {strides = array<i32>} : memref<1x2x16x16xf32, #tpu.memory_space<vmem>>, vector<1x1x16x16xf32>,
    %c0_11 = arith.constant 0 : index
    %c1 = arith.constant 1 : index
    %c0_12 = arith.constant 0 : index
    %c0_13 = arith.constant 0 : index
    %9 = vector.load %arg4[%c0_11, %c1, %c0_12, %c0_13] : memref<1x2x16x16xf32, #tpu.memory_space<vmem>>, vector<1x1x16x16xf32>
    %10 = vector.shape_cast %9 : vector<1x1x16x16xf32> to vector<16x16xf32>
    %11 = vector.shape_cast %5 : vector<16x16xf32> to vector<1x1x16x16xf32>
    tpu.vector_store %arg4[%c0_11, %c1, %c0_12, %c0_13], %11 {strides = array<i32>} : memref<1x2x16x16xf32, #tpu.memory_space<vmem>>, vector<1x1x16x16xf32>,
    return
  }
  func.func @transform_0(%arg0: i32) -> (i32, i32, i32) {
    %c0_i32 = arith.constant 0 : i32
    %c0_i32_0 = arith.constant 0 : i32
    %c0_i32_1 = arith.constant 0 : i32
    return %arg0, %c0_i32, %c0_i32_0 : i32, i32, i32
  }
  func.func @transform_1(%arg0: i32) -> (i32, i32) {
    %c0_i32 = arith.constant 0 : i32
    %c0_i32_0 = arith.constant 0 : i32
    %c0_i32_1 = arith.constant 0 : i32
    return %c0_i32, %c0_i32_0 : i32, i32
  }
  func.func @transform_2(%arg0: i32) -> (i32, i32) {
    %c0_i32 = arith.constant 0 : i32
    %c0_i32_0 = arith.constant 0 : i32
    %c0_i32_1 = arith.constant 0 : i32
    return %c0_i32, %c0_i32_0 : i32, i32
  }
  func.func @transform_3(%arg0: i32) -> (i32, i32, i32, i32) {
    %c0_i32 = arith.constant 0 : i32
    %c0_i32_0 = arith.constant 0 : i32
    %c0_i32_1 = arith.constant 0 : i32
    %c0_i32_2 = arith.constant 0 : i32
    return %arg0, %c0_i32, %c0_i32_0, %c0_i32_1 : i32, i32, i32, i32
  }
}

</mosaic_0001>

<bundles_post_ra>
// kernel: tpu_custom_call.1
= control target key start
LH: loop header
LB: loop body
LE: loop exit
PB: predicated region body
PF: predicated region fallthrough
CT: control target
= control target key end

     0   :  { %8 = vsyncpa [#allocation3], 0  ;;  %s999_s0 = inlined_call_operand.hbm [shape: bf16[2,16,16], index: 0, kind: input, shape index: {}]   ;;  %s1000_s1 = inlined_call_operand.hbm [shape: bf16[16,16], index: 1, kind: input, shape index: {}]   ;;  %s1001_s2 = inlined_call_operand.hbm [shape: bf16[16,16], index: 2, kind: input, shape index: {}]   ;;  %s1002_s3 = inlined_call_operand.hbm [shape: f32[2,2,16,16], index: 3, kind: output, shape index: {}]  }
   0x1   :  { %10 = vsyncpa [#allocation3 + $0x1], 0 }
   0x2   :  { %11 = vsyncpa [#allocation6], 0 }
   0x3   :  { %12 = vsyncpa [#allocation4], 0 }
   0x4   :  { %14 = vsyncpa [#allocation4 + $0x1], 0  ;;  %s749_s12 = smov 0   ;;  %s751_s13 = smov 0  }
   0x5   :  { %s753_s14 = smov 0   ;;  %s755_s15 = smov 0  }
   0x6 LB: > { %s770_s16 = sadd.s32 4294967295, %s717_s15   ;;  %s442_s17 = sadd.s32 4294967294, %s717_s15   ;;  %s717_s15 = sphi %s755_s15, %s1022_s15   ;;  %s713_s14 = sphi %s753_s14, %s1021_s14   ;;  %s709_s13 = sphi %s751_s13, %s1020_s13   ;;  %s705_s12 = sphi %s749_s12, %s1019_s12  }
   0x7   : > { %p40_p0 = scmp.ne.s32.totalorder %s709_s13, %s705_s12  ;;  %p1003_p1 = scmp.eq.s32.totalorder %s770_s16, 0 }
   0x8   : > { %p112_p3 = scmp.eq.s32.totalorder %s442_s17, 1  ;;  %p443_p5 = scmp.ge.s32.totalorder %s717_s15, 1 }
   0x9   : > { %p779_p4 = por %p1003_p1, %p40_p0  ;;  %p119_p7 = scmp.lt.s32.totalorder %s717_s15, 3 }
   0xa   : > { %p784_p6 = por %p112_p3, %p40_p0  ;;  %s719_s21 = smov [#allocation5]  }
   0xb   : > { %s1006_s18 = scalar_select %p779_p4, 1, 0 }
   0xc   : > { %s1007_s19 = scalar_select %p784_p6, 1, 0 }
   0xd   : > { %p789_p8 = pnand %p443_p5, %p119_p7  ;;  %s131_s22 = sshll.u32 %s719_s21, 4  ;;  %s793_s22 = int_to_ptr.vmem [resolvable:$true] %s131_s22 }
   0xe   : > { %s720_s24 = smov [#allocation7]   ;;  %s561_s28 = scalar_lea.hbm %s1000_s1, 128 }
   0xf   : > { %p497_p9 = pneg %p789_p8  ;;  %s144_s25 = sshll.u32 %s720_s24, 4  ;;  %s804_s25 = int_to_ptr.vmem [resolvable:$true] %s144_s25 }
  0x10   : > { %p562_p12 = scmp.ne.s32.totalorder %s1000_s1, %s561_s28  ;;  %p568_p5 = scmp.lt.u32.totalorder %s561_s28, %s1000_s1 }
  0x11   : > { %p800_p11 = pnand %p497_p9, %p1003_p1 }
  0x13   : > { %p563_p13 = pneg %p800_p11 }
  0x15   : > { %p564_p0 = pnand %p563_p13, %p562_p12 }
  0x17   : > { %p565_p3 = pneg %p564_p0 }
  0x19   : > { %p570_p7 = pnand %p568_p5, %p565_p3 }
  0x1b   : > { %573 = shalt.err (!%p570_p7)
}
  0x1c   : > { %s574_s6 = scalar_lea.vmem %s793_s22, 128  ;;  %p582_p2 = scmp.lt.s32.totalorder %s793_s22, %s793_s22 }
  0x1d   : > { %p575_p9 = scmp.ne.s32.totalorder %s793_s22, %s574_s6  ;;  %p583_p12 = scmp.lt.s32.totalorder %s574_s6, %s574_s6 }
  0x1f   : > { %p577_p10 = pnand %p575_p9, %p563_p13  ;;  %p584_p0 = por %p583_p12, %p582_p2 }
  0x21   : > { %p578_p1 = pneg %p577_p10 }
  0x23   : > { %p585_p6 = pnand %p584_p0, %p578_p1 }
  0x25   : > { %588 = shalt.err (!%p585_p6)
}
  0x26   : > { %s721_s7 = smov 64   ;;  %s722_s8 = smov 4  }
  0x27   : > { %500 = dma.hbm_to_vmem [thread:$0]  (!%p800_p11), %s1000_s1, 128, %s793_s22, [#allocation6], %s721_s7, %s721_s7, %s722_s8  }
  0x28   : > { %s589_s21 = scalar_lea.hbm %s1001_s2, 128 }
  0x29   : > { %p590_p1 = scmp.ne.s32.totalorder %s1001_s2, %s589_s21  ;;  %p596_p10 = scmp.lt.u32.totalorder %s589_s21, %s1001_s2 }
  0x2b   : > { %p592_p2 = pnand %p590_p1, %p563_p13 }
  0x2d   : > { %p593_p6 = pneg %p592_p2 }
  0x2f   : > { %p598_p3 = pnand %p596_p10, %p593_p6 }
  0x31   : > { %601 = shalt.err (!%p598_p3)
}
  0x32   : > { %s602_s22 = scalar_lea.vmem %s804_s25, 128  ;;  %p610_p12 = scmp.lt.s32.totalorder %s804_s25, %s804_s25 }
  0x33   : > { %p603_p5 = scmp.ne.s32.totalorder %s804_s25, %s602_s22  ;;  %p611_p0 = scmp.lt.s32.totalorder %s602_s22, %s602_s22 }
  0x35   : > { %p605_p7 = pnand %p603_p5, %p563_p13  ;;  %p612_p1 = por %p611_p0, %p610_p12 }
  0x37   : > { %p606_p9 = pneg %p605_p7 }
  0x39   : > { %p613_p2 = pnand %p612_p1, %p606_p9 }
  0x3b   : > { %616 = shalt.err (!%p613_p2)
}
  0x3c   : > { %503 = dma.hbm_to_vmem [thread:$0]  (!%p800_p11), %s1001_s2, 128, %s804_s25, [#allocation6], %s721_s7, %s721_s7, %s722_s8  }
  0x3d   : > { %s865_s23 = sadd.s32 1, %s717_s15   ;;  %s27_s4 = sadd.s32 1, %s713_s14 }
  0x3e   : > { %s24_s5 = ssub.s32 %s717_s15, %s865_s23  ;;  %p34_p13 = scmp.ne.s32.totalorder %s713_s14, %s709_s13 }
  0x3f   : > { %p25_p6 = scmp.eq.s32.totalorder %s24_s5, 0  ;;  %p35_p10 = scmp.eq.s32.totalorder %s717_s15, 0 }
  0x40   : > { %p1010_p3 = scmp.eq.s32.totalorder %s770_s16, 1  ;;  %p514_p7 = scmp.lt.s32.totalorder %s717_s15, 2 }
  0x41   : > { %s881_s9 = scalar_select %p25_p6, %s713_s14, %s27_s4  }
  0x42   : > { %p875_p5 = por %p1010_p3, %p34_p13  ;;  %p36_p9 = por %p35_p10, %p34_p13 }
  0x43   : > { %s158_s10 = sand.u32 1, %s713_s14   ;;  %s467_s25 = sshll.u32 %s717_s15, 7 }
  0x44   : > { %s1011_s6 = scalar_select %p875_p5, 1, 0 }
  0x45   : > { %s447_s11 = sshll.u32 %s158_s10, 3  ;;  %s888_s24 = scalar_lea.hbm %s999_s0, %s467_s25 }
  0x46   : > { %s162_s26 = scalar_lea.vmem [#allocation2], %s447_s11  ;;  %p892_p11 = pnand %p514_p7, %p36_p9 }
  0x47   : > { %s169_s27 = sshll.u32 %s162_s26, 4  ;;  %s896_s22 = scalar_lea.sflag [#allocation3], %s158_s10  ;;  %s890_s27 = int_to_ptr.vmem [resolvable:$true] %s169_s27 }
  0x48   : > { %s617_s29 = scalar_lea.hbm %s888_s24, 128  ;;  %p619_p0 = pneg %p892_p11 }
  0x49   : > { %p618_p12 = scmp.ne.s32.totalorder %s888_s24, %s617_s29  ;;  %s622_s5 = scalar_lea.hbm %s999_s0, 256 }
  0x4a   : > { %p623_p13 = scmp.lt.u32.totalorder %s888_s24, %s999_s0  ;;  %p624_p6 = scmp.lt.u32.totalorder %s622_s5, %s617_s29 }
  0x4b   : > { %p620_p1 = pnand %p619_p0, %p618_p12  ;;  %p626_p3 = scmp.lt.u32.totalorder %s617_s29, %s888_s24 }
  0x4c   : > { %p625_p10 = por %p624_p6, %p623_p13 }
  0x4d   : > { %p621_p2 = pneg %p620_p1 }
  0x4e   : > { %p627_p7 = por %p626_p3, %p625_p10 }
  0x50   : > { %p628_p9 = pnand %p627_p7, %p621_p2 }
  0x52   : > { %631 = shalt.err (!%p628_p9)
}
  0x53   : > { %s632_s10 = scalar_lea.vmem %s890_s27, 128  ;;  %s723_s17 = smov [#allocation2]  }
  0x54   : > { %p633_p12 = scmp.ne.s32.totalorder %s890_s27, %s632_s10  ;;  %s637_s21 = sshll.u32 %s723_s17, 4  ;;  %s638_s21 = int_to_ptr.vmem [resolvable:$false] %s637_s21 }
  0x55   : > { %s639_s26 = scalar_lea.vmem %s638_s21, 256  ;;  %p640_p4 = scmp.lt.s32.totalorder %s890_s27, %s638_s21 }
  0x56   : > { %p635_p1 = pnand %p633_p12, %p619_p0  ;;  %p641_p13 = scmp.lt.s32.totalorder %s639_s26, %s632_s10 }
  0x58   : > { %p636_p5 = pneg %p635_p1  ;;  %p642_p6 = por %p641_p13, %p640_p4 }
  0x5a   : > { %p643_p10 = pnand %p642_p6, %p636_p5 }
  0x5c   : > { %646 = shalt.err (!%p643_p10)
}
  0x5d   : > { %507 = dma.hbm_to_vmem [thread:$0]  (!%p892_p11), %s888_s24, 128, %s890_s27, %s896_s22, %s721_s7, %s721_s7, %s722_s8  }
  0x5e   : > { %181 = sbr.rel (%p789_p8) target bundleno = 340 (0x154), region = 32  ;;  %s930_s29 = sand.u32 (!%p789_p8), 1, %s709_s13  }
  0x5f   : > { %s451_s30 = sshll.u32 (!%p789_p8), %s930_s29, 3  ;;  %s184_s4 = scalar_lea.sflag (!%p789_p8), [#allocation3], %s930_s29 }
  0x60   : > { %s187_s5 = scalar_lea.vmem (!%p789_p8), [#allocation2], %s451_s30  ;;  %p1013_p4 = scmp.ne.s32.totalorder (!%p789_p8), %s1006_s18, 0 }
  0x65   : > { %692 = dma.done.wait (%p1013_p4), %s184_s4, 128  }
  0x66   : > { %694 = vsyncadd (%p1013_p4), %s184_s4, 4294967168  ;;  %p1014_p5 = scmp.eq.s32.totalorder %s770_s16, 0 }
  0x68   : > { %696 = dma.done.wait (%p1014_p5), [#allocation6], 256   ;;  %p1015_p11 = pmov %p1014_p5 }
  0x69   : > { %v724_v0 = vmov 0.0   ;;  %vm725_vm0 = vmmov 0   ;;  %v558_v1 = vld [vmem:[%s187_s5] sm:$0xff]   ;;  %v559_v2 = vld [vmem:[#allocation7] sm:$0xff]   ;;  %v560_v3 = vld [vmem:[#allocation5] sm:$0xff]   ;;  %vm234_vm1 = vcmask 130048  }
  0x6a   : > { %698 = vsyncadd (%p1015_p11), [#allocation6], 4294967040  ;;  %473 = vmatprep.subr.bf16.mxu0 %v724_v0  ;;  %479 = vmatprep.subr.bf16.mxu1 %v724_v0  ;;  %s454_s18 = sshll.u32 %s930_s29, 5  ;;  %s468_s8 = sshll.u32 %s770_s16, 9 }
  0x6b   : > { %475 = vmatprep.mubr.msk.bf16.mxu0 %vm725_vm0, %v724_v0  ;;  %481 = vmatprep.mubr.msk.bf16.mxu1 %vm725_vm0, %v724_v0  ;;  %s217_s20 = scalar_lea.vmem [#allocation8], %s454_s18  ;;  %s952_s28 = scalar_lea.hbm %s1002_s3, %s468_s8 }
  0x6c   : > { %474 = vmatpush3.bf16.msra.mxu0 %v558_v1  ;;  %480 = vmatpush3.bf16.msra.mxu1 %v559_v2  ;;  %s350_s7 = sshll.u32 %s217_s20, 4  ;;  %s337_s16 = scalar_lea.sflag [#allocation4], %s930_s29  ;;  %s946_s7 = int_to_ptr.vmem [resolvable:$true] %s350_s7 }
  0x6d   : > { %s647_s22 = scalar_lea.vmem %s946_s7, 512  ;;  %p1016_p0 = scmp.ne.s32.totalorder %s1011_s6, 0 }
  0x6e   : > { %p648_p8 = scmp.ne.s32.totalorder %s946_s7, %s647_s22  ;;  %s726_s11 = smov [#allocation8]  }
  0x6f   : > { %476 = vmatmul.mubr.msk.bf16.vlgmr.msra.gmra.mrb[0].mxu0 %vm234_vm1, %v560_v3  ;;  %482 = vmatmul.mubr.msk.bf16.vlgmr.msra.gmra.mrb[0].mxu1 %vm234_vm1, %v558_v1  ;;  %s651_s25 = sshll.u32 %s726_s11, 4  ;;  %s652_s25 = int_to_ptr.vmem [resolvable:$false] %s651_s25 }
  0x70   : > { %p649_p2 = pnand %p648_p8, %p1016_p0  ;;  %s653_s10 = scalar_lea.vmem %s652_s25, 1024 }
  0x71   : > { %p654_p7 = scmp.lt.s32.totalorder %s946_s7, %s652_s25  ;;  %p655_p9 = scmp.lt.s32.totalorder %s653_s10, %s647_s22 }
  0x72   : > { %p650_p3 = pneg %p649_p2 }
  0x73   : > { %p656_p12 = por %p655_p9, %p654_p7 }
  0x75   : > { %p657_p1 = pnand %p656_p12, %p650_p3 }
 0x142   : > { %v272_v4 = vpop.f32.mrb[0].mxu0  ;;  %v324_v5 = vpop.f32.mrb[0].mxu1 }
 0x143   : > { %331 = vst.msk [vmem:[%s217_s20] sm:$0xff] %vm234_vm1, %v272_v4  ;;  %v477_v6 = vpop.f32.mrb[1].mxu0  ;;  %460 = vst.msk [vmem:[%s217_s20 + $0x10] sm:$0xff] %vm234_vm1, %v324_v5  ;;  %v483_v7 = vpop.f32.mrb[1].mxu1 }
 0x144   : > { %v275_v8 = vpop.f32.mrb[2].mxu0  ;;  %v327_v9 = vpop.f32.mrb[2].mxu1 }
 0x145   : > { %332 = vst.msk [vmem:[%s217_s20 + $0x8] sm:$0xff] %vm234_vm1, %v275_v8  ;;  %v478_v10 = vpop.f32.mrb[3].mxu0  ;;  %461 = vst.msk [vmem:[%s217_s20 + $0x18] sm:$0xff] %vm234_vm1, %v327_v9  ;;  %v484_v11 = vpop.f32.mrb[3].mxu1 }
 0x146   : > { %660 = shalt.err (!%p657_p1)
}
 0x147   : > { %s661_s17 = scalar_lea.hbm %s952_s28, 512  ;;  %s665_s30 = scalar_lea.hbm %s1002_s3, 1024 }
 0x148   : > { %p662_p13 = scmp.ne.s32.totalorder %s952_s28, %s661_s17  ;;  %p666_p4 = scmp.lt.u32.totalorder %s952_s28, %s1002_s3 }
 0x149   : > { %p667_p5 = scmp.lt.u32.totalorder %s665_s30, %s661_s17  ;;  %p669_p8 = scmp.lt.u32.totalorder %s661_s17, %s952_s28 }
 0x14a   : > { %p663_p6 = pnand %p662_p13, %p1016_p0 }
 0x14b   : > { %p668_p11 = por %p667_p5, %p666_p4 }
 0x14c   : > { %p664_p10 = pneg %p663_p6 }
 0x14d   : > { %p670_p2 = por %p669_p8, %p668_p11 }
 0x14f   : > { %p671_p3 = pnand %p670_p2, %p664_p10 }
 0x151   : > { %674 = shalt.err (!%p671_p3)
}
 0x152   : > { %s727_s18 = smov 128   ;;  %s728_s20 = smov 8  }
 0x153   : > { %495 = dma.vmem_to_hbm [thread:$0]  (%p1016_p0), %s946_s7, 512, %s952_s28, %s337_s16, %s727_s18, %s727_s18, %s728_s20  }
 0x154 PF: > { %s365_s8 = sand.u32 1, %s705_s12   ;;  %p1017_p7 = scmp.ne.s32.totalorder %s1007_s19, 0 }
 0x155   : > { %p1018_p9 = scmp.ge.s32.totalorder %s717_s15, 2  ;;  %s366_s24 = scalar_lea.sflag [#allocation4], %s365_s8 }
 0x157   : > { %p509_p12 = pnand %p1018_p9, %p1017_p7 }
 0x159   : > { %700 = dma.done.wait (!%p509_p12), %s366_s24, 512  }
 0x15a   : > { %702 = vsyncadd (!%p509_p12), %s366_s24, 4294966784  ;;  %p17_p1 = scmp.ge.s32.totalorder %s865_s23, 4   ;;  %s1019_s12 = smov %s709_s13 }
 0x15b   : > { %s1020_s13 = smov %s713_s14  ;;  %s1021_s14 = smov %s881_s9 }
 0x15c   : > { %s1022_s15 = smov %s865_s23  ;;  %19 = sbr.rel (!%p17_p1) target bundleno = 6 (0x6), region = 86 }
 0x163   :  { %371 = vsyncpa [#allocation3], 1 }
 0x164   :  { %373 = vsyncpa [#allocation3 + $0x1], 1 }
 0x165   :  { %374 = vsyncpa [#allocation6], 1 }
 0x166   :  { %375 = vsyncpa [#allocation4], 1 }
 0x167   :  { %377 = vsyncpa [#allocation4 + $0x1], 1 }

</bundles_post_ra>
